<compile_context>
chip_gen: v7x
topology: tpu7x:2x2x1
jax: 0.10.0
libtpu: 0.0.40
codegen_flags: <defaults>
</compile_context>

<pallas_src>
import math
import functools

import jax
import jax.numpy as jnp
from jax import lax
from jax.experimental import pallas as pl
from jax.experimental.pallas import tpu as pltpu

TEMPERATURE = 10000.0


def _round_up(x, m):
    return ((x + m - 1) // m) * m


def _rot_point3d_kernel(pts_ref, w_ref, vec_ref, projw_ref, out_ref, *, embed_dims):
    """One N-tile of the forward pass.

    pts_ref   : (TN, KP) f32   raw (x, y, z) in lanes 0..2, one-hot class at
                               lane 3+label, zeros elsewhere (built host-side)
    w_ref     : (KP, 2D) f32   fused selection/label matrix; coord rows already
                               scaled by scale/(hi-lo)
    vec_ref   : (2, D)   f32   row 0: pre-sin bias (phase {0,pi/2} + folded
                               -lo*scale/(hi-lo)/dim_t), row 1: query_proj bias
    projw_ref : (D, D)         query_proj weight (already transposed)
    out_ref   : (TN, 2D)       [query_pos | query_embedding]
    """
    D = embed_dims

    # ONE small-K MXU matmul produces both the pre-sin positional values
    # (cols 0..D) and the gathered label embedding (cols D..2D).
    # precision=HIGHEST: keep f32 fidelity of the pre-sin arguments (~2*pi).
    both = jnp.dot(pts_ref[...], w_ref[...],
                   preferred_element_type=jnp.float32,
                   precision=lax.Precision.HIGHEST)                    # (TN, 2D)
    pre = both[:, 0:D]
    label_emb = both[:, D:2 * D]

    # Interleaved sin/cos with a single phase-shifted sin over all D lanes
    # (cos(x) = sin(x + pi/2)); pad lanes have pre == 0 and bias == 0 -> 0.
    pos_emb = jnp.sin(pre + vec_ref[0:1, :])                           # (TN, D)

    # query_proj (nn.Linear): proj_dtype operands, f32 accumulation on the MXU.
    query_emb = label_emb + pos_emb
    query_emb = jnp.dot(query_emb.astype(projw_ref.dtype), projw_ref[...],
                        preferred_element_type=jnp.float32) + vec_ref[1:2, :]

    # Two lane-aligned stores instead of materializing a (TN, 2D) concat.
    out_ref[:, 0:D] = pos_emb.astype(out_ref.dtype)
    out_ref[:, D:2 * D] = query_emb.astype(out_ref.dtype)


def _build_constants(pc_range, label_weight, wlh_table, proj_b, *,
                     embed_dims, num_classes, scale):
    """Host-side precompute of all per-call constants (O(C*D) work)."""
    D = embed_dims
    num_params = 6                                        # with_wlh=True
    P = D // num_params
    if P % 2 == 1:
        P -= 1
    KP = _round_up(3 + num_classes, 8)                    # coord + class lanes, padded

    j = jnp.arange(P, dtype=jnp.float32)
    inv_dim_t = TEMPERATURE ** (-(2.0 * jnp.floor(j / 2.0)) / P)       # (P,)

    lo, hi = pc_range[:3], pc_range[3:]
    mul3 = scale / (hi - lo)                              # per-axis normalization scale
    add3 = -lo * mul3                                     # per-axis normalization offset

    w_vals = wlh_table[:, 0]                              # dict_wlh[...][0] (width)
    l_vals = wlh_table[:, 1]                              # dict_wlh[...][2] (length)

    # Pre-sin selection matrix (KP, D): channel block order is (y, x, z, w, l, l).
    # Coord rows carry the normalization scale (mul folded in).
    sel = jnp.zeros((KP, D), jnp.float32)
    sel = sel.at[0, 1 * P:2 * P].set(mul3[0] * inv_dim_t)          # x -> block 1
    sel = sel.at[1, 0 * P:1 * P].set(mul3[1] * inv_dim_t)          # y -> block 0
    sel = sel.at[2, 2 * P:3 * P].set(mul3[2] * inv_dim_t)          # z -> block 2
    sel = sel.at[3:3 + num_classes, 3 * P:4 * P].set(w_vals[:, None] * inv_dim_t)
    sel = sel.at[3:3 + num_classes, 4 * P:5 * P].set(l_vals[:, None] * inv_dim_t)
    # NOTE: pos_h reuses pos_l in the reference implementation (upstream bug
    # reproduced on purpose).
    sel = sel.at[3:3 + num_classes, 5 * P:6 * P].set(l_vals[:, None] * inv_dim_t)

    # Label-embedding rows occupy cols [D, 2D) of the same matrix.
    lbl = jnp.zeros((KP, D), jnp.float32).at[3:3 + num_classes, :].set(label_weight)
    w_fused = jnp.concatenate([sel, lbl], axis=1)         # (KP, 2D)

    # Pre-sin bias: sin/cos phase shift plus the folded normalization offset.
    lane = jnp.arange(D)
    phase = jnp.where(lane % 2 == 1, math.pi / 2.0, 0.0)  # cos(x) = sin(x + pi/2)
    phase = jnp.where(lane < num_params * P, phase, 0.0)  # pad lanes -> sin(0) = 0
    add_bias = jnp.zeros((D,), jnp.float32)
    add_bias = add_bias.at[1 * P:2 * P].set(add3[0] * inv_dim_t)   # x
    add_bias = add_bias.at[0 * P:1 * P].set(add3[1] * inv_dim_t)   # y
    add_bias = add_bias.at[2 * P:3 * P].set(add3[2] * inv_dim_t)   # z
    presin_bias = (phase.astype(jnp.float32) + add_bias)[None, :]  # (1, D)

    # Pack the two small per-lane vectors into a single resident input.
    vec_const = jnp.concatenate(
        [presin_bias, proj_b.reshape(1, D).astype(jnp.float32)], axis=0)  # (2, D)
    return w_fused, vec_const, KP


def rot_point3d_encoder(point_coord, labels, pc_range, params, *,
                        embed_dims, num_classes, scale=2.0 * math.pi,
                        tile_n=2048, proj_dtype=jnp.bfloat16,
                        out_dtype=jnp.float32):
    """point_coord: (N,3) f32, labels: (N,1) int, pc_range: (6,) f32.
    Returns (1, N, 2*embed_dims) — the batch_size==1 case of the module.

    tile_n: upper bound on the N-tile.  The actual tile is ceil(N/steps)
      rounded to 8, so small N gets one minimally-padded grid step while
      large N uses ~tile_n rows/step to amortize per-step pipeline overhead
      (the kernel is writeback-bound).  On v7x prefer a tile_n that makes the
      grid an even number of steps so the 'parallel' axis splits over both TCs.
    proj_dtype: operand dtype of the D x D query_proj matmul (f32 accumulate);
      jnp.float32 for a bit-faithful projection.
    out_dtype: output dtype; jnp.bfloat16 halves the dominant HBM writeback
      when the consumer accepts it.
    """
    N = point_coord.shape[0]
    D = embed_dims

    w_fused, vec_const, KP = _build_constants(
        pc_range, params["label_weight"], params["wlh_table"], params["proj_b"],
        embed_dims=D, num_classes=num_classes, scale=scale)

    # Tile selection: bound per-step rows by tile_n, minimize padded writeback.
    N_eff = max(N, 1)
    steps = -(-N_eff // tile_n)                    # ceil-div
    TN = _round_up(-(-N_eff // steps), 8)
    Npad = TN * steps

    # Layout plumbing only: coords in lanes 0..2, one-hot class at lane 3+label.
    # (Out-of-range / sentinel labels would silently drop the one-hot here;
    # the module assumes valid labels in [0, num_classes).)
    lbl = labels[:, 0].astype(jnp.int32)
    coord_p = jnp.zeros((Npad, KP), jnp.float32)
    coord_p = coord_p.at[:N, :3].set(point_coord.astype(jnp.float32))
    coord_p = coord_p.at[jnp.arange(N), lbl + 3].set(1.0)

    proj_w_t = params["proj_w_t"].astype(proj_dtype)

    kernel = functools.partial(_rot_point3d_kernel, embed_dims=D)

    out = pl.pallas_call(
        kernel,
        out_shape=jax.ShapeDtypeStruct((Npad, 2 * D), out_dtype),
        grid=(Npad // TN,),
        in_specs=[
            pl.BlockSpec((TN, KP), lambda i: (i, 0)),        # points (tiled over N)
            pl.BlockSpec((KP, 2 * D), lambda i: (0, 0)),     # fused sel/label matrix
            pl.BlockSpec((2, D), lambda i: (0, 0)),          # pre-sin bias | proj bias
            pl.BlockSpec((D, D), lambda i: (0, 0)),          # query_proj W^T
        ],
        out_specs=pl.BlockSpec((TN, 2 * D), lambda i: (i, 0)),
        compiler_params=pltpu.CompilerParams(
            dimension_semantics=("parallel",)),              # shards over v7x's 2 TCs
    )(coord_p, w_fused, vec_const, proj_w_t)

    # torch.stack(all_embeddings, dim=0) with batch_size == 1
    return out[:N][None]
    # TODO(synk): the try/except IndexError fallback and the "no positive
    # queries" (size(1)==0) fallback are host-side control flow; not implemented.


def init_params(num_classes, embed_dims, key):
    """Deterministic parameter setup mirroring __init__/init_weight."""
    (k_lbl,) = jax.random.split(key, 1)
    # learnable_label=True, rot_label=False -> nn.init.uniform_ (U[0,1))
    label_weight = jax.random.uniform(k_lbl, (num_classes, embed_dims),
                                      dtype=jnp.float32)
    # Synthetic dict_wlh / gtlabels2names: per-class (w, l, h) stats
    # (= dict_wlh[name][0], [2], [4] in the reference).
    cls = jnp.arange(num_classes, dtype=jnp.float32)
    wlh_table = jnp.stack([1.0 + 0.25 * cls,     # w
                           2.0 + 0.50 * cls,     # l
                           1.5 + 0.10 * cls],    # h (unused: pos_h reuses pos_l)
                          axis=1)                # (C, 3)
    # constant_init(query_proj, val=1.0, bias=0.0); kernel consumes W^T.
    proj_w_t = jnp.ones((embed_dims, embed_dims), jnp.float32)
    proj_b = jnp.zeros((1, embed_dims), jnp.float32)
    return {"label_weight": label_weight, "wlh_table": wlh_table,
            "proj_w_t": proj_w_t, "proj_b": proj_b}


def _reference_forward(point_coord, labels, pc_range, params, *,
                       embed_dims, scale):
    """Pure-JAX (f32) transliteration of the PyTorch forward, for validation."""
    D = embed_dims
    P = D // 6
    if P % 2 == 1:
        P -= 1
    pad = D - 6 * P
    lo, hi = pc_range[:3], pc_range[3:]
    normed = (point_coord - lo) / (hi - lo) * scale
    j = jnp.arange(P, dtype=jnp.float32)
    dim_t = TEMPERATURE ** ((2.0 * jnp.floor(j / 2.0)) / P)

    def enc(v):                                           # (N,) -> (N, P)
        a = v[:, None] / dim_t
        return jnp.stack([jnp.sin(a[:, 0::2]), jnp.cos(a[:, 1::2])],
                         axis=2).reshape(v.shape[0], P)

    lbl = labels[:, 0]
    w = params["wlh_table"][lbl, 0]
    l = params["wlh_table"][lbl, 1]
    pos = jnp.concatenate([enc(normed[:, 1]), enc(normed[:, 0]), enc(normed[:, 2]),
                           enc(w), enc(l), enc(l)], axis=-1)   # pos_h bug reproduced
    if pad > 0:
        pos = jnp.concatenate(
            [pos, jnp.zeros((pos.shape[0], pad), jnp.float32)], axis=-1)
    label_emb = params["label_weight"][lbl]
    q = label_emb + pos
    q = q @ params["proj_w_t"] + params["proj_b"]
    return jnp.concatenate([pos, q], axis=-1)[None]


if __name__ == "__main__":
    num_classes = 10
    embed_dims = 128      # -> pos3d_dim = 20, pad_dim = 8
    N = 8                 # number of 3-D points (queries), batch_size = 1

    key = jax.random.PRNGKey(0)
    k_coord, k_lbl, k_param = jax.random.split(key, 3)

    pc_range = jnp.array([-51.2, -51.2, -5.0, 51.2, 51.2, 3.0], jnp.float32)
    lo, hi = pc_range[:3], pc_range[3:]
    point_coord = jax.random.uniform(k_coord, (N, 3), jnp.float32) * (hi - lo) + lo
    labels = jax.random.randint(k_lbl, (N, 1), 0, num_classes, dtype=jnp.int32)

    params = init_params(num_classes, embed_dims, k_param)

    # f32 output path (default) — validated against the pure-JAX reference.
    out = rot_point3d_encoder(point_coord, labels, pc_range, params,
                              embed_dims=embed_dims, num_classes=num_classes)
    out = jax.block_until_ready(out)
    assert out.shape == (1, N, 2 * embed_dims), out.shape
    assert bool(jnp.all(jnp.isfinite(out)))

    ref = _reference_forward(point_coord, labels, pc_range, params,
                             embed_dims=embed_dims, scale=2.0 * math.pi)
    # bf16 query_proj operands -> loose-ish tolerance (positional part is f32-exact).
    assert bool(jnp.allclose(out, ref, rtol=2e-2, atol=6e-2))

    # bf16 output path (halves HBM writeback) — exercised for shape/finiteness.
    out_bf16 = rot_point3d_encoder(point_coord, labels, pc_range, params,
                                   embed_dims=embed_dims, num_classes=num_classes,
                                   out_dtype=jnp.bfloat16)
    out_bf16 = jax.block_until_ready(out_bf16)
    assert out_bf16.shape == (1, N, 2 * embed_dims)
    assert out_bf16.dtype == jnp.bfloat16
    assert bool(jnp.all(jnp.isfinite(out_bf16.astype(jnp.float32))))

    print("KERNEL_OK")
</pallas_src>

<mosaic_0001>
module attributes {stable_mosaic.version = 11 : i64} {
  func.func @_rot_point3d_kernel(%arg0: i32, %arg1: memref<8x16xf32, #tpu.memory_space<vmem>>, %arg2: memref<16x256xf32, #tpu.memory_space<vmem>>, %arg3: memref<2x128xf32, #tpu.memory_space<vmem>>, %arg4: memref<128x128xbf16, #tpu.memory_space<vmem>>, %arg5: memref<8x256xf32, #tpu.memory_space<vmem>>) attributes {dimension_semantics = [#tpu.dimension_semantics<parallel>], iteration_bounds = array<i64: 1>, scalar_prefetch = 0 : i64, scratch_operands = 0 : i64, tpu.core_type = #tpu.core_type<tc>, window_params = [{transform_indices = @transform_0, window_bounds = array<i64: 8, 16>}, {pipeline_mode = #tpu.pipeline_mode<synchronous>, transform_indices = @transform_1, window_bounds = array<i64: 16, 256>}, {pipeline_mode = #tpu.pipeline_mode<synchronous>, transform_indices = @transform_2, window_bounds = array<i64: 2, 128>}, {pipeline_mode = #tpu.pipeline_mode<synchronous>, transform_indices = @transform_3, window_bounds = array<i64: 128, 128>}, {transform_indices = @transform_4, window_bounds = array<i64: 8, 256>}]} {
    %c0 = arith.constant 0 : index
    %c0_0 = arith.constant 0 : index
    %0 = vector.load %arg1[%c0, %c0_0] : memref<8x16xf32, #tpu.memory_space<vmem>>, vector<8x16xf32>
    %c0_1 = arith.constant 0 : index
    %c0_2 = arith.constant 0 : index
    %1 = vector.load %arg2[%c0_1, %c0_2] : memref<16x256xf32, #tpu.memory_space<vmem>>, vector<16x256xf32>
    %cst = arith.constant dense<0.000000e+00> : vector<8x256xf32>
    %2 = tpu.matmul %0, %1, %cst {dimension_numbers = #tpu.dot_dimension_numbers<[1], [0], [0], [1], [0, 0, 1, 1], [], []>, precision = #tpu.contract_precision<fp32>} : vector<8x16xf32>, vector<16x256xf32>, vector<8x256xf32> -> vector<8x256xf32>
    %3 = vector.extract_strided_slice %2 {offsets = [0, 0], sizes = [8, 128], strides = [1, 1]} : vector<8x256xf32> to vector<8x128xf32>
    %4 = vector.extract_strided_slice %2 {offsets = [0, 128], sizes = [8, 128], strides = [1, 1]} : vector<8x256xf32> to vector<8x128xf32>
    %c0_3 = arith.constant 0 : index
    %c0_4 = arith.constant 0 : index
    %5 = vector.load %arg3[%c0_3, %c0_4] : memref<2x128xf32, #tpu.memory_space<vmem>>, vector<1x128xf32>
    %6 = vector.broadcast %5 : vector<1x128xf32> to vector<8x128xf32>
    %7 = arith.addf %3, %6 : vector<8x128xf32>
    %8 = math.sin %7 : vector<8x128xf32>
    %9 = arith.addf %4, %8 : vector<8x128xf32>
    %10 = arith.truncf %9 : vector<8x128xf32> to vector<8x128xbf16>
    %c0_5 = arith.constant 0 : index
    %c0_6 = arith.constant 0 : index
    %11 = vector.load %arg4[%c0_5, %c0_6] : memref<128x128xbf16, #tpu.memory_space<vmem>>, vector<128x128xbf16>
    %cst_7 = arith.constant dense<0.000000e+00> : vector<8x128xf32>
    %12 = tpu.matmul %10, %11, %cst_7 {dimension_numbers = #tpu.dot_dimension_numbers<[1], [0], [0], [1], [0, 0, 1, 1], [], []>} : vector<8x128xbf16>, vector<128x128xbf16>, vector<8x128xf32> -> vector<8x128xf32>
    %c1 = arith.constant 1 : index
    %c0_8 = arith.constant 0 : index
    %13 = vector.load %arg3[%c1, %c0_8] : memref<2x128xf32, #tpu.memory_space<vmem>>, vector<1x128xf32>
    %14 = vector.broadcast %13 : vector<1x128xf32> to vector<8x128xf32>
    %15 = arith.addf %12, %14 : vector<8x128xf32>
    %c0_9 = arith.constant 0 : index
    %c0_10 = arith.constant 0 : index
    %16 = vector.load %arg5[%c0_9, %c0_10] : memref<8x256xf32, #tpu.memory_space<vmem>>, vector<8x128xf32>
    tpu.vector_store %arg5[%c0_9, %c0_10], %8 {strides = array<i32>} : memref<8x256xf32, #tpu.memory_space<vmem>>, vector<8x128xf32>,
    %c0_11 = arith.constant 0 : index
    %c128 = arith.constant 128 : index
    %17 = vector.load %arg5[%c0_11, %c128] : memref<8x256xf32, #tpu.memory_space<vmem>>, vector<8x128xf32>
    tpu.vector_store %arg5[%c0_11, %c128], %15 {strides = array<i32>} : memref<8x256xf32, #tpu.memory_space<vmem>>, vector<8x128xf32>,
    return
  }
  func.func @transform_0(%arg0: i32) -> (i32, i32) {
    %c0_i32 = arith.constant 0 : i32
    %c0_i32_0 = arith.constant 0 : i32
    return %arg0, %c0_i32 : i32, i32
  }
  func.func @transform_1(%arg0: i32) -> (i32, i32) {
    %c0_i32 = arith.constant 0 : i32
    %c0_i32_0 = arith.constant 0 : i32
    %c0_i32_1 = arith.constant 0 : i32
    return %c0_i32, %c0_i32_0 : i32, i32
  }
  func.func @transform_2(%arg0: i32) -> (i32, i32) {
    %c0_i32 = arith.constant 0 : i32
    %c0_i32_0 = arith.constant 0 : i32
    %c0_i32_1 = arith.constant 0 : i32
    return %c0_i32, %c0_i32_0 : i32, i32
  }
  func.func @transform_3(%arg0: i32) -> (i32, i32) {
    %c0_i32 = arith.constant 0 : i32
    %c0_i32_0 = arith.constant 0 : i32
    %c0_i32_1 = arith.constant 0 : i32
    return %c0_i32, %c0_i32_0 : i32, i32
  }
  func.func @transform_4(%arg0: i32) -> (i32, i32) {
    %c0_i32 = arith.constant 0 : i32
    %c0_i32_0 = arith.constant 0 : i32
    return %arg0, %c0_i32 : i32, i32
  }
}

</mosaic_0001>

<bundles_post_ra>
// kernel: tpu_custom_call.1
= control target key start
LH: loop header
LB: loop body
LE: loop exit
PB: predicated region body
PF: predicated region fallthrough
CT: control target
= control target key end

     0   :  { %9 = vsyncpa [#allocation3], 0  ;;  %s1134_s0 = inlined_call_operand.hbm [shape: f32[8,16], index: 0, kind: input, shape index: {}]   ;;  %s1135_s1 = inlined_call_operand.hbm [shape: f32[16,256], index: 1, kind: input, shape index: {}]   ;;  %s1136_s2 = inlined_call_operand.vmem [shape: f32[2,128], index: 2, kind: input, shape index: {}]   ;;  %s1137_s3 = inlined_call_operand.hbm [shape: bf16[128,128], index: 3, kind: input, shape index: {}]   ;;  %s1138_s4 = inlined_call_operand.hbm [shape: f32[8,256], index: 4, kind: output, shape index: {}]  }
   0x1   :  { %10 = vsyncpa [#allocation6], 0 }
   0x2   :  { %11 = vsyncpa [#allocation4], 0  ;;  %s1000_s15 = smov [#allocation5]   ;;  %s906_s19 = scalar_lea.hbm %s1135_s1, 512 }
   0x3   :  { %s27_s16 = sshll.u32 %s1000_s15, 4  ;;  %p907_p0 = scmp.ne.s32.totalorder %s1135_s1, %s906_s19  ;;  %s28_s16 = int_to_ptr.vmem [resolvable:$true] %s27_s16 }
   0x4   :  { %p910_p1 = scmp.lt.u32.totalorder %s906_s19, %s1135_s1 }
   0x6   :  { %p912_p2 = pnand %p910_p1, %p907_p0 }
   0x8   :  { %915 = shalt.err (!%p912_p2)
}
   0x9   :  { %s916_s24 = scalar_lea.vmem %s28_s16, 512  ;;  %p921_p4 = scmp.lt.s32.totalorder %s28_s16, %s28_s16 }
   0xa   :  { %p917_p3 = scmp.ne.s32.totalorder %s28_s16, %s916_s24  ;;  %p922_p5 = scmp.lt.s32.totalorder %s916_s24, %s916_s24 }
   0xc   :  { %p923_p6 = por %p922_p5, %p921_p4 }
   0xe   :  { %p924_p7 = pnand %p923_p6, %p917_p3 }
  0x10   :  { %927 = shalt.err (!%p924_p7)
}
  0x11   :  { %s1001_s25 = smov 256   ;;  %s1002_s26 = smov 16  }
  0x12   :  { %33 = dma.hbm_to_vmem [thread:$0]  %s1135_s1, 512, %s28_s16, [#allocation6], %s1001_s25, %s1001_s25, %s1002_s26  }
  0x13   :  { %s1003_s29 = smov [#allocation2]   ;;  %s1004_s5 = smov [#allocation7]  }
  0x14   :  { %s18_s30 = sshll.u32 %s1003_s29, 4  ;;  %s41_s6 = sshll.u32 %s1004_s5, 4  ;;  %s19_s30 = int_to_ptr.vmem [resolvable:$true] %s18_s30  ;;  %s42_s6 = int_to_ptr.vmem [resolvable:$true] %s41_s6 }
  0x15   :  { %s928_s9 = scalar_lea.hbm %s1134_s0, 128 }
  0x16   :  { %p929_p8 = scmp.ne.s32.totalorder %s1134_s0, %s928_s9  ;;  %p932_p9 = scmp.lt.u32.totalorder %s928_s9, %s1134_s0 }
  0x18   :  { %p934_p10 = pnand %p932_p9, %p929_p8 }
  0x1a   :  { %937 = shalt.err (!%p934_p10)
}
  0x1b   :  { %s938_s1 = scalar_lea.vmem %s19_s30, 128  ;;  %p943_p12 = scmp.lt.s32.totalorder %s19_s30, %s19_s30 }
  0x1c   :  { %p939_p11 = scmp.ne.s32.totalorder %s19_s30, %s938_s1  ;;  %p944_p13 = scmp.lt.s32.totalorder %s938_s1, %s938_s1 }
  0x1e   :  { %p945_p0 = por %p944_p13, %p943_p12 }
  0x20   :  { %p946_p1 = pnand %p945_p0, %p939_p11 }
  0x22   :  { %949 = shalt.err (!%p946_p1)
}
  0x23   :  { %21 = dma.hbm_to_vmem [thread:$0]  %s1134_s0, 128, %s19_s30, [#allocation3]  }
  0x24   :  { %s950_s18 = scalar_lea.hbm %s1137_s3, 1024 }
  0x25   :  { %p951_p2 = scmp.ne.s32.totalorder %s1137_s3, %s950_s18  ;;  %p954_p3 = scmp.lt.u32.totalorder %s950_s18, %s1137_s3 }
  0x27   :  { %p956_p4 = pnand %p954_p3, %p951_p2 }
  0x29   :  { %959 = shalt.err (!%p956_p4)
}
  0x2a   :  { %s960_s23 = scalar_lea.vmem %s42_s6, 1024  ;;  %p965_p6 = scmp.lt.s32.totalorder %s42_s6, %s42_s6 }
  0x2b   :  { %p961_p5 = scmp.ne.s32.totalorder %s42_s6, %s960_s23  ;;  %p966_p7 = scmp.lt.s32.totalorder %s960_s23, %s960_s23 }
  0x2d   :  { %p967_p8 = por %p966_p7, %p965_p6 }
  0x2f   :  { %p968_p9 = pnand %p967_p8, %p961_p5 }
  0x31   :  { %971 = shalt.err (!%p968_p9)
}
  0x32   :  { %s1005_s0 = smov 64   ;;  %s1006_s24 = smov 4  }
  0x33   :  { %47 = dma.hbm_to_vmem [thread:$0]  %s1137_s3, 1024, %s42_s6, [#allocation6], %s1005_s0, %s1005_s0, %s1006_s24  }
  0x34   :  { %994 = dma.done.wait [#allocation3], 128  }
  0x35   :  { %995 = vsyncadd [#allocation3], 4294967168 }
  0x36   :  { %996 = dma.done.wait [#allocation6], 1536  }
  0x37   :  { %997 = vsyncadd [#allocation6], 4294965760  ;;  %v1007_v0 = vmov 0.0   ;;  %vm63_vm0 = vcmask 130048   ;;  %v60_v1 = vld [vmem:[#allocation5 + $0x8] sm:$0xff]  ;;  %v62_v2 = vld [vmem:[#allocation5 + $0x18] sm:$0xff] }
  0x38   :  { %135 = vmatprep.mubr.f32.mxu0 %v1007_v0  ;;  %820 = vmatprep.subr.bf16.mxu1 %v1007_v0  ;;  %v59_v3 = vld [vmem:[#allocation5] sm:$0xff]  ;;  %v67_v4 = vand.u32 4294901760, %v60_v1  ;;  %v71_v5 = vand.u32 4294901760, %v62_v2  ;;  %v61_v6 = vld [vmem:[#allocation5 + $0x10] sm:$0xff]  ;;  %v58_v8 = vld [vmem:[#allocation2] sm:$0xff]  ;;  %vm1008_vm1 = vmmov 0  }
  0x39   :  { %v69_v7 = vand.u32 4294901760, %v59_v3  ;;  %v73_v9 = vand.u32 4294901760, %v61_v6  ;;  %v65_v10 = vsel %vm63_vm0, %v58_v8, 0  ;;  %v894_v40 = vld [vmem:[#allocation7] sm:$0xff]   ;;  %v895_v41 = vld [vmem:[#allocation7 + $0x8] sm:$0xff]   ;;  %v896_v42 = vld [vmem:[#allocation7 + $0x10] sm:$0xff]   ;;  %836 = vmatprep.mubr.msk.bf16.mxu1 %vm1008_vm1, %v1007_v0 }
  0x3a   :  { %v840_v11 = vpack.c.bf16 %v71_v5, %v67_v4  ;;  %v148_v12 = vsub.f32 %v60_v1, %v67_v4  ;;  %v160_v13 = vsub.f32 %v62_v2, %v71_v5  ;;  %v136_v17 = vand.u32 4294901760, %v65_v10  ;;  %821 = vmatpush3.bf16.msra.mxu1 %v894_v40  ;;  %v897_v43 = vld [vmem:[#allocation7 + $0x18] sm:$0xff]   ;;  %v898_v44 = vld [vmem:[#allocation7 + $0x20] sm:$0xff]   ;;  %v899_v45 = vld [vmem:[#allocation7 + $0x28] sm:$0xff]   ;;  %s1015_s30 = smov [#allocation8]  }
  0x3b   :  { %v154_v14 = vsub.f32 %v59_v3, %v69_v7  ;;  %v842_v15 = vpack.c.bf16 %v73_v9, %v69_v7  ;;  %v166_v16 = vsub.f32 %v61_v6, %v73_v9  ;;  %822 = vmatprep.subr.bf16.mxu1 %v1007_v0  ;;  %v900_v46 = vld [vmem:[#allocation7 + $0x30] sm:$0xff]   ;;  %v901_v47 = vld [vmem:[#allocation7 + $0x38] sm:$0xff]   ;;  %v1009_v63 = vmov 2102212464   ;;  %s787_s5 = sshll.u32 %s1015_s30, 4  ;;  %s788_s5 = int_to_ptr.vmem [resolvable:$true] %s787_s5 }
  0x3c   :  { %841 = vmatprep.subr.bf16.mxu0 %v840_v11  ;;  %v149_v18 = vand.u32 4294901760, %v148_v12  ;;  %v161_v19 = vand.u32 4294901760, %v160_v13  ;;  %v137_v21 = vsub.f32 %v65_v10, %v136_v17  ;;  %v848_v36 = vpack.c.bf16 %v160_v13, %v148_v12  ;;  %v797_v48 = vld [vmem:[%s1136_s2] ss:$0 sm:$0xff]  ;;  %s972_s6 = scalar_lea.vmem %s788_s5, 256  ;;  %p977_p11 = scmp.lt.s32.totalorder %s788_s5, %s788_s5 }
  0x3d   :  { %v155_v20 = vand.u32 4294901760, %v154_v14  ;;  %843 = vmatpush1.bf16.msra.mxu0 %v842_v15  ;;  %v167_v22 = vand.u32 4294901760, %v166_v16  ;;  %v850_v37 = vpack.c.bf16 %v166_v16, %v154_v14  ;;  %v1010_v1 = vmov 920167782   ;;  %p973_p10 = scmp.ne.s32.totalorder %s788_s5, %s972_s6  ;;  %p978_p12 = scmp.lt.s32.totalorder %s972_s6, %s972_s6 }
  0x3e   :  { %v150_v23 = vsub.f32 %v148_v12, %v149_v18  ;;  %v162_v24 = vsub.f32 %v160_v13, %v161_v19  ;;  %v138_v26 = vand.u32 4294901760, %v137_v21  ;;  %v856_v38 = vpack.c.bf16 %v161_v19, %v149_v18  ;;  %823 = vmatpush3.bf16.msra.mxu1 %v895_v41 }
  0x3f   :  { %v156_v25 = vsub.f32 %v154_v14, %v155_v20  ;;  %v168_v27 = vsub.f32 %v166_v16, %v167_v22  ;;  %v858_v39 = vpack.c.bf16 %v167_v22, %v155_v20  ;;  %824 = vmatprep.subr.bf16.mxu1 %v1007_v0  ;;  %v1011_v5 = vmov 1326507024   ;;  %p979_p13 = por %p978_p12, %p977_p11 }
  0x40   :  { %v151_v28 = vand.u32 4294901760, %v150_v23  ;;  %v163_v29 = vand.u32 4294901760, %v162_v24  ;;  %v139_v31 = vsub.f32 %v137_v21, %v138_v26  ;;  %v1012_v7 = vmov 683565275  }
  0x41   :  { %v157_v30 = vand.u32 4294901760, %v156_v25  ;;  %v169_v32 = vand.u32 4294901760, %v168_v27  ;;  %v1013_v9 = vmov 2475754826   ;;  %v1014_v12 = vmov 2131351028   ;;  %p980_p0 = pnand %p979_p13, %p973_p10 }
  0x42   :  { %v844_v33 = vpack.c.bf16 %v163_v29, %v151_v28  ;;  %v140_v34 = vand.u32 4294901760, %v139_v31  ;;  %825 = vmatpush3.bf16.msra.mxu1 %v896_v42 }
  0x43   :  { %v846_v35 = vpack.c.bf16 %v169_v32, %v157_v30  ;;  %826 = vmatprep.subr.bf16.mxu1 %v1007_v0 }
  0x44   :  { %845 = vmatprep.subr.bf16.mxu0 %v844_v33  ;;  %141 = vmatmul.mubr.f32.vlgmr.msra.gmra.mrb[0].mxu0 %v140_v34 }
  0x45   :  { %847 = vmatpush1.bf16.msra.mxu0 %v846_v35  ;;  %231 = vmatprep.mubr.f32.mxu0 %v1007_v0 }
  0x46   :  { %849 = vmatprep.subr.bf16.mxu0 %v848_v36  ;;  %827 = vmatpush3.bf16.msra.mxu1 %v897_v43 }
  0x47   :  { %828 = vmatprep.subr.bf16.mxu1 %v1007_v0 }
  0x4a   :  { %829 = vmatpush3.bf16.msra.mxu1 %v898_v44 }
  0x4b   :  { %830 = vmatprep.subr.bf16.mxu1 %v1007_v0 }
  0x4c   :  { %233 = vmatmul.mubr.f32.vlgmr.msra.gmra.mrb[0].mxu0 %v136_v17 }
  0x4d   :  { %851 = vmatpush1.bf16.msra.mxu0 %v850_v37  ;;  %311 = vmatprep.mubr.f32.mxu0 %v1007_v0 }
  0x4e   :  { %853 = vmatprep.subr.bf16.mxu0 %v840_v11  ;;  %831 = vmatpush3.bf16.msra.mxu1 %v899_v45 }
  0x4f   :  { %832 = vmatprep.subr.bf16.mxu1 %v1007_v0 }
  0x52   :  { %833 = vmatpush3.bf16.msra.mxu1 %v900_v46 }
  0x53   :  { %834 = vmatprep.subr.bf16.mxu1 %v1007_v0 }
  0x54   :  { %314 = vmatmul.mubr.f32.vlgmr.msra.gmra.mrb[0].mxu0 %v137_v21 }
  0x55   :  { %855 = vmatpush1.bf16.msra.mxu0 %v842_v15  ;;  %388 = vmatprep.mubr.f32.mxu0 %v1007_v0 }
  0x56   :  { %857 = vmatprep.subr.bf16.mxu0 %v856_v38  ;;  %835 = vmatpush3.bf16.msra.mxu1 %v901_v47 }
  0x5c   :  { %392 = vmatmul.mubr.f32.vlgmr.msra.gmra.mrb[0].mxu0 %v138_v26 }
  0x5d   :  { %859 = vmatpush1.bf16.msra.mxu0 %v858_v39  ;;  %474 = vmatprep.mubr.f32.mxu0 %v1007_v0 }
  0x5e   :  { %861 = vmatprep.subr.bf16.mxu0 %v840_v11 }
  0x64   :  { %476 = vmatmul.mubr.f32.vlgmr.msra.gmra.mrb[0].mxu0 %v136_v17 }
  0x65   :  { %863 = vmatpush1.bf16.msra.mxu0 %v842_v15  ;;  %550 = vmatprep.mubr.f32.mxu0 %v1007_v0 }
  0x6c   :  { %552 = vmatmul.mubr.f32.vlgmr.msra.gmra.mrb[0].mxu0 %v136_v17 }
 0x13f   :  { %v553_v49 = vpop.f32.mrb[0].mxu0 }
 0x140   :  { %v1095_v50 = vadd.f32 %v797_v48, %v553_v49  ;;  %v1097_v51 = vpop.f32.mrb[1].mxu0 }
 0x142   :  { %v567_v52 = vand.u32 2139095040, %v1095_v50  ;;  %v564_v53 = vand.u32 2147483647, %v1095_v50  ;;  %vm566_vm9 = vcmp.lt.s32.totalorder %v1095_v50, 0  ;;  %vm656_vm14 = vweird.f32 %v1095_v50 }
 0x144   :  { %v568_v54 = vshrl.u32 %v567_v52, 23  ;;  %v571_v56 = vand.u32 8388607, %v564_v53  ;;  %vm565_vm10 = vcmp.le.f32.partialorder %v564_v53, 0.7853982 }
 0x146   :  { %v798_v55 = vadd.s32 4294967169, %v568_v54  ;;  %v572_v59 = vor.u32 8388608, %v571_v56 }
 0x148   :  { %v574_v57 = vadd.s32 1, %v798_v55  ;;  %v612_v3 = vshll.u32 %v572_v59, 8 }
 0x14a   :  { %vm575_vm2 = vcmp.gt.s32.totalorder %v574_v57, 0 }
 0x14b   :  { %v576_v58 = vsel %vm575_vm2, %v574_v57, 0 }
 0x14c   :  { %v578_v60 = vand.u32 31, %v576_v58  ;;  %v577_v61 = vshrl.u32 %v576_v58, 5 }
 0x14e   :  { %v579_v62 = vsub.s32 32, %v578_v60  ;;  %v590_v0 = vshll.u32 %v1009_v63, %v578_v60  ;;  %v593_v2 = vshll.u32 %v1010_v1, %v578_v60  ;;  %v581_v8 = vshll.u32 %v1012_v7, %v578_v60 }
 0x14f   :  { %v584_v11 = vshll.u32 %v1013_v9, %v578_v60  ;;  %v587_v14 = vshll.u32 %v1014_v12, %v578_v60  ;;  %vm599_vm3 = vcmp.lt.s32.totalorder %v577_v61, 4  ;;  %vm596_vm4 = vcmp.lt.s32.totalorder %v577_v61, 1 }
 0x150   :  { %v591_v4 = vshrl.u32 %v1010_v1, %v579_v62  ;;  %v594_v6 = vshrl.u32 %v1011_v5, %v579_v62  ;;  %v582_v10 = vshrl.u32 %v1013_v9, %v579_v62  ;;  %v585_v13 = vshrl.u32 %v1014_v12, %v579_v62 }
 0x151   :  { %v588_v15 = vshrl.u32 %v1009_v63, %v579_v62  ;;  %v580_v19 = vshrl.u32 %v1012_v7, %v579_v62  ;;  %vm597_vm5 = vcmp.lt.s32.totalorder %v577_v61, 2  ;;  %vm598_vm6 = vcmp.lt.s32.totalorder %v577_v61, 3 }
 0x152   :  { %v592_v16 = vor.u32 %v591_v4, %v590_v0  ;;  %v595_v17 = vor.u32 %v594_v6, %v593_v2  ;;  %v583_v18 = vor.u32 %v582_v10, %v581_v8  ;;  %v586_v20 = vor.u32 %v585_v13, %v584_v11 }
 0x153   :  { %v589_v21 = vor.u32 %v588_v15, %v587_v14 }
 0x154   :  { %v605_v22 = vsel %vm599_vm3, %v592_v16, 920167782  ;;  %v609_v23 = vsel %vm599_vm3, %v595_v17, 1326507024  ;;  %v604_v25 = vsel %vm596_vm4, %v583_v18, %v586_v20  ;;  %v600_v28 = vsel %vm596_vm4, %v580_v19, %v583_v18  ;;  %v802_v19 = vld [vmem:[%s1136_s2 + $0x1] ss:$0 sm:$0xff] }
 0x155   :  { %v601_v24 = vsel %vm599_vm3, %v589_v21, 2102212464  ;;  %v606_v26 = vsel %vm598_vm6, %v589_v21, %v605_v22  ;;  %v608_v27 = vsel %vm596_vm4, %v586_v20, %v589_v21  ;;  %v610_v31 = vsel %vm598_vm6, %v592_v16, %v609_v23 }
 0x156   :  { %v602_v29 = vsel %vm598_vm6, %v586_v20, %v601_v24  ;;  %v607_v30 = vsel %vm597_vm5, %v604_v25, %v606_v26  ;;  %v611_v32 = vsel %vm597_vm5, %v608_v27, %v610_v31 }
 0x157   :  { %v1103_v33 = vmul.u32.u64.low %v612_v3, %v607_v30  ;;  %v1104_v34 = vmul.u32.u64.high %v612_v3, %v607_v30, %v1103_v33  ;;  %v1106_v35 = vmul.u32.u64.low %v612_v3, %v611_v32  ;;  %v1107_v36 = vmul.u32.u64.high %v612_v3, %v611_v32, %v1106_v35 }
 0x158   :  { %v603_v37 = vsel %vm597_vm5, %v600_v28, %v602_v29 }
 0x159   :  { %v622_v38 = vadd.s32 1, %v1104_v34  ;;  %v619_v39 = vmul.u32 %v612_v3, %v603_v37  ;;  %vm621_vm7 = vc.u32 %v1107_v36, %v1103_v33  ;;  %v620_v54 = vadd.s32 %v1103_v33, %v1107_v36 }
 0x15b   :  { %v623_v40 = vsel %vm621_vm7, %v622_v38, %v1104_v34 }
 0x15c   :  { %v624_v41 = vadd.s32 %v623_v40, %v619_v39 }
 0x15e   :  { %v625_v42 = vadd.s32 536870912, %v624_v41 }
 0x160   :  { %v626_v43 = vshrl.u32 %v625_v42, 30 }
 0x162   :  { %v627_v44 = vshll.u32 %v626_v43, 30  ;;  %v650_v2 = vsub.s32 4, %v626_v43 }
 0x164   :  { %v628_v45 = vsub.s32 %v624_v41, %v627_v44  ;;  %v651_v5 = vsel %vm566_vm9, %v650_v2, %v626_v43 }
 0x165   :  { %v653_v7 = vsel %vm565_vm10, 0, %v651_v5 }
 0x166   :  { %v630_v46 = vsub.s32 0, %v628_v45  ;;  %v657_v8 = vadd.s32 3, %v653_v7 }
 0x168   :  { %v799_v47 = vmin.u32 %v630_v46, %v628_v45  ;;  %v658_v9 = vand.u32 3, %v657_v8 }
 0x16a   :  { %v632_v48 = vclz %v799_v47  ;;  %vm663_vm11 = vcmp.eq.s32.totalorder %v658_v9, 2  ;;  %vm660_vm12 = vcmp.eq.s32.totalorder %v658_v9, 0  ;;  %vm659_vm13 = vcmp.lt.s32.totalorder %v658_v9, 2 }
 0x16c   :  { %v800_v49 = vadd.s32 4294967294, %v632_v48 }
 0x16e   :  { %vm801_vm8 = vcmp.lt.s32.totalorder %v800_v49, 0 }
 0x16f   :  { %v635_v52 = vsel %vm801_vm8, 0, %v800_v49 }
 0x170   :  { %v636_v55 = vsub.s32 32, %v635_v52  ;;  %v640_v56 = vsub.s32 4294967266, %v635_v52  ;;  %v637_v57 = vshll.u32 %v628_v45, %v635_v52 }
 0x172   :  { %v638_v58 = vshrl.u32 %v620_v54, %v636_v55  ;;  %v641_v59 = vadd.s32 127, %v640_v56 }
 0x174   :  { %v639_v60 = vor.u32 %v638_v58, %v637_v57  ;;  %v642_v61 = vshll.u32 %v641_v59, 23 }
 0x176   :  { %v643_v62 = vor.u32 4788187, %v642_v61  ;;  %v646_v0 = vcvt.s32.f32 %v639_v60 }
 0x178   :  { %v644_v63 = vand.u32 2147483647, %v643_v62 }
 0x17a   :  { %v647_v1 = vmul.f32 %v646_v0, %v644_v63 }
 0x17c   :  { %v648_v3 = vxor.u32 2147483648, %v647_v1 }
 0x17e   :  { %v649_v4 = vsel %vm566_vm9, %v648_v3, %v647_v1 }
 0x17f   :  { %v652_v6 = vsel %vm565_vm10, %v1095_v50, %v649_v4 }
 0x180   :  { %902 = vcosq.f32 %v652_v6 }
 0x181   :  { %904 = vsinq.f32 %v652_v6 }
 0x18a   :  { %v903_v10 = vpop.eup %902 }
 0x18b   :  { %v905_v11 = vpop.eup %904  ;;  %v664_v12 = vxor.u32 2147483648, %v903_v10 }
 0x18c   :  { %v661_v13 = vxor.u32 2147483648, %v905_v11 }
 0x18d   :  { %v665_v14 = vsel %vm663_vm11, %v664_v12, %v905_v11 }
 0x18e   :  { %v662_v15 = vsel %vm660_vm12, %v903_v10, %v661_v13 }
 0x18f   :  { %v666_v53 = vsel %vm659_vm13, %v662_v15, %v665_v14 }
 0x190   :  { %v667_v16 = vsel %vm656_vm14, nan, %v666_v53 }
 0x191   :  { %v668_v17 = vadd.f32 %v667_v16, %v1097_v51  ;;  %779 = vst [vmem:[#allocation8] sm:$0xff] %v667_v16 }
 0x193   :  { %v669_v18 = vpack.c.bf16 %v668_v17, %v668_v17 }
 0x195   :  { %837 = vmatmul.mubr.bf16.vlgmr.msra.gmra.mrb[0].mxu1 %v669_v18 }
 0x268   :  { %v773_v20 = vpop.f32.mrb[0].mxu1 }
 0x269   :  { %v774_v21 = vadd.f32 %v802_v19, %v773_v20  ;;  %v838_v22 = vpop.f32.mrb[1].mxu1 }
 0x26a   :  { %v776_v23 = vpop.f32.mrb[2].mxu1 }
 0x26b   :  { %780 = vst [vmem:[#allocation8 + $0x8] sm:$0xff] %v774_v21  ;;  %v839_v50 = vpop.f32.mrb[3].mxu1 }
 0x26c   :  { %983 = shalt.err (!%p980_p0)
}
 0x26d   :  { %s984_s2 = scalar_lea.hbm %s1138_s4, 256 }
 0x26e   :  { %p985_p1 = scmp.ne.s32.totalorder %s1138_s4, %s984_s2  ;;  %p988_p2 = scmp.lt.u32.totalorder %s984_s2, %s1138_s4 }
 0x270   :  { %p990_p3 = pnand %p988_p2, %p985_p1 }
 0x272   :  { %993 = shalt.err (!%p990_p3)
}
 0x273   :  { %790 = dma.vmem_to_hbm [thread:$0]  %s788_s5, 256, %s1138_s4, [#allocation4]  }
 0x274   :  { %998 = dma.done.wait [#allocation4], 256  }
 0x275   :  { %999 = vsyncadd [#allocation4], 4294967040 }
 0x276   :  { %794 = vsyncpa [#allocation3], 1 }
 0x277   :  { %795 = vsyncpa [#allocation6], 1 }
 0x278   :  { %796 = vsyncpa [#allocation4], 1 }

</bundles_post_ra>
